<compile_context>
chip_gen: v6e
topology: v6e:2x2x1
jax: 0.10.0
libtpu: 0.0.40
codegen_flags: <defaults>
</compile_context>

<pallas_src>
import jax
import jax.numpy as jnp
from jax.experimental import pallas as pl
from jax.experimental.pallas import tpu as pltpu

_LANE = 128
_SUB = 8
_TILE_ROWS_MAX = 256  # 256 * 128 = 32768 batch elements per grid step

# SMEM scalar-vector layout (39 f32):
#  [0:12]  h1 folded scale  = w1 * rsqrt(bn_var + eps)
#  [12]    h1 folded shift  = b1 - sum(bn_mean * scale)
#  [13]    w2[0]  (h1 weight of hidden2)
#  [14:19] w2[1:6] (orderer weights)
#  [19]    b2
#  [20]    w3[0]  (h1 weight of hidden3)
#  [21]    w3[1]  (h2 weight of hidden3)
#  [22:34] w3[2:14] (peer weights)
#  [34]    b3
#  [35:38] wo[0:3]
#  [38]    bo


def _regression_fwd_kernel(params_ref,          # SMEM (39,) f32
                           peer_ref,            # VMEM (12, TR, 128)
                           ord_ref,             # VMEM (5,  TR, 128)
                           out_ref):            # VMEM (TR, 128)
    # hidden1 (BN folded into Linear) and the peer-part of hidden3 share one pass
    # over the 12 peer feature rows (each row is a dense (TR, 128) slab).
    p0 = peer_ref[0]
    acc1 = params_ref[0] * p0
    acc3 = params_ref[22] * p0
    for k in range(1, 12):
        pk = peer_ref[k]
        acc1 = acc1 + params_ref[k] * pk
        acc3 = acc3 + params_ref[22 + k] * pk
    h1 = jnp.maximum(acc1 + params_ref[12], 0.0)

    # hidden2: Linear(6,1) on cat(h1, orderer) -> ReLU (concat folded into weights)
    acc2 = params_ref[13] * h1 + params_ref[19]
    for k in range(5):
        acc2 = acc2 + params_ref[14 + k] * ord_ref[k]
    h2 = jnp.maximum(acc2, 0.0)

    # hidden3: Linear(14,1) on cat(h1, h2, peer) -> ReLU
    h3 = jnp.maximum(acc3 + params_ref[20] * h1 + params_ref[21] * h2 + params_ref[34],
                     0.0)

    # output: Linear(3,1) on cat(h1, h2, h3)
    out_ref[...] = (params_ref[35] * h1 + params_ref[36] * h2
                    + params_ref[37] * h3 + params_ref[38])


def _pack_scalars(params):
    eps = jnp.float32(params["eps"])
    bn_mean = jnp.asarray(params["bn_mean"], jnp.float32).reshape(12)
    bn_var = jnp.asarray(params["bn_var"], jnp.float32).reshape(12)
    w1 = jnp.asarray(params["w1"], jnp.float32).reshape(12)
    b1 = jnp.asarray(params["b1"], jnp.float32).reshape(())
    w2 = jnp.asarray(params["w2"], jnp.float32).reshape(6)
    b2 = jnp.asarray(params["b2"], jnp.float32).reshape(())
    w3 = jnp.asarray(params["w3"], jnp.float32).reshape(14)
    b3 = jnp.asarray(params["b3"], jnp.float32).reshape(())
    wo = jnp.asarray(params["wo"], jnp.float32).reshape(3)
    bo = jnp.asarray(params["bo"], jnp.float32).reshape(())

    # Fold eval-mode BatchNorm into the first Linear (one-time (1,12) work, outside).
    scale = w1 * jax.lax.rsqrt(bn_var + eps)
    shift = b1 - jnp.sum(bn_mean * scale)

    return jnp.concatenate([
        scale,                       # [0:12]
        shift[None],                 # [12]
        w2[0:1],                     # [13]
        w2[1:6],                     # [14:19]
        b2[None],                    # [19]
        w3[0:2],                     # [20:22]
        w3[2:14],                    # [22:34]
        b3[None],                    # [34]
        wo,                          # [35:38]
        bo[None],                    # [38]
    ]).astype(jnp.float32)


def regression_forward(peer_config, orderer_config, params):
    """Pallas equivalent of RegressionModel.forward (eval mode). Returns (B, 1) f32."""
    peer = jnp.asarray(peer_config, jnp.float32)
    orderer = jnp.asarray(orderer_config, jnp.float32)
    if peer.ndim == 1:
        peer = peer.reshape(1, 12)
    if orderer.ndim == 1:
        orderer = orderer.reshape(1, 5)
    assert peer.shape[1] == 12 and orderer.shape[1] == 5
    assert peer.shape[0] == orderer.shape[0]
    B = peer.shape[0]

    scalars = _pack_scalars(params)          # (39,) f32 -> SMEM (pads to 256 B)

    # ---- batch tiling: lane-dense SoA layout (F, n_rows, 128) ----
    rows_needed = pl.cdiv(B, _LANE)                       # 128-lane groups of batch
    if rows_needed <= _SUB:
        tile_rows = _SUB                                  # tiny batch: one small block
    else:
        rows8 = pl.cdiv(rows_needed, _SUB) * _SUB
        # big tiles (amortize ~0.35us/step) but keep >=2 grid blocks for v7x megacore
        tile_rows = min(_TILE_ROWS_MAX, max(_SUB, (rows8 // 2 // _SUB) * _SUB))
    n_rows = pl.cdiv(rows_needed, tile_rows) * tile_rows
    nb = n_rows // tile_rows
    b_pad = n_rows * _LANE

    pad = b_pad - B
    if pad:
        peer = jnp.pad(peer, ((0, pad), (0, 0)))
        orderer = jnp.pad(orderer, ((0, pad), (0, 0)))

    # feature-major, batch fills (sublane, lane): element b -> (b // 128, b % 128)
    peer_t = peer.T.reshape(12, n_rows, _LANE)
    ord_t = orderer.T.reshape(5, n_rows, _LANE)

    out = pl.pallas_call(
        _regression_fwd_kernel,
        out_shape=jax.ShapeDtypeStruct((n_rows, _LANE), jnp.float32),
        grid=(nb,),
        in_specs=[
            pl.BlockSpec(memory_space=pltpu.SMEM),                    # 39 scalars
            pl.BlockSpec((12, tile_rows, _LANE), lambda i: (0, i, 0)),  # peer SoA tile
            pl.BlockSpec((5, tile_rows, _LANE), lambda i: (0, i, 0)),   # orderer SoA tile
        ],
        out_specs=pl.BlockSpec((tile_rows, _LANE), lambda i: (i, 0)),
        compiler_params=pltpu.CompilerParams(
            dimension_semantics=("parallel",)),
    )(scalars, peer_t, ord_t)

    return out.reshape(-1)[:B].reshape(B, 1)


if __name__ == "__main__":
    key = jax.random.PRNGKey(0)
    ks = jax.random.split(key, 12)

    params = dict(
        eps=1e-5,
        bn_mean=jax.random.normal(ks[2], (12,), jnp.float32) * 0.1,
        bn_var=jax.random.uniform(ks[3], (12,), jnp.float32, minval=0.5, maxval=1.5),
        w1=jax.random.normal(ks[4], (1, 12), jnp.float32) * 0.3,
        b1=jax.random.normal(ks[5], (1,), jnp.float32) * 0.1,
        w2=jax.random.normal(ks[6], (1, 6), jnp.float32) * 0.3,
        b2=jax.random.normal(ks[7], (1,), jnp.float32) * 0.1,
        w3=jax.random.normal(ks[8], (1, 14), jnp.float32) * 0.3,
        b3=jax.random.normal(ks[9], (1,), jnp.float32) * 0.1,
        wo=jax.random.normal(ks[10], (1, 3), jnp.float32) * 0.3,
        bo=jax.random.normal(ks[11], (1,), jnp.float32) * 0.1,
    )

    def ref_forward(peer, orderer):
        x_hat = (peer - params["bn_mean"]) / jnp.sqrt(params["bn_var"] + params["eps"])
        h1 = jax.nn.relu(x_hat @ params["w1"].T + params["b1"])
        h2 = jax.nn.relu(jnp.concatenate([h1, orderer], 1) @ params["w2"].T + params["b2"])
        h3 = jax.nn.relu(jnp.concatenate([h1, h2, peer], 1) @ params["w3"].T + params["b3"])
        return jnp.concatenate([h1, h2, h3], 1) @ params["wo"].T + params["bo"]

    # Small batch (single block) and a multi-block batch (exercises padding + parallel grid).
    for B in (4, 2500):
        peer = jax.random.normal(jax.random.fold_in(ks[0], B), (B, 12), jnp.float32)
        orderer = jax.random.normal(jax.random.fold_in(ks[1], B), (B, 5), jnp.float32)

        out = regression_forward(peer, orderer, params)
        jax.block_until_ready(out)

        ref = ref_forward(peer, orderer)
        assert out.shape == (B, 1), out.shape
        err = jnp.max(jnp.abs(out - ref))
        assert jnp.allclose(out, ref, atol=2e-5, rtol=1e-4), (B, err)

    print("KERNEL_OK")
</pallas_src>

<mosaic_0001>
module attributes {stable_mosaic.version = 11 : i64} {
  func.func @_regression_fwd_kernel(%arg0: i32, %arg1: memref<39xf32, #tpu.memory_space<smem>>, %arg2: memref<12x8x128xf32, #tpu.memory_space<vmem>>, %arg3: memref<5x8x128xf32, #tpu.memory_space<vmem>>, %arg4: memref<8x128xf32, #tpu.memory_space<vmem>>) attributes {dimension_semantics = [#tpu.dimension_semantics<parallel>], iteration_bounds = array<i64: 1>, scalar_prefetch = 0 : i64, scratch_operands = 0 : i64, tpu.core_type = #tpu.core_type<tc>, window_params = [{transform_indices = @transform_0, window_bounds = array<i64: 39>}, {transform_indices = @transform_1, window_bounds = array<i64: 12, 8, 128>}, {transform_indices = @transform_2, window_bounds = array<i64: 5, 8, 128>}, {transform_indices = @transform_3, window_bounds = array<i64: 8, 128>}]} {
    %c0 = arith.constant 0 : index
    %c0_0 = arith.constant 0 : index
    %c0_1 = arith.constant 0 : index
    %0 = vector.load %arg2[%c0, %c0_0, %c0_1] : memref<12x8x128xf32, #tpu.memory_space<vmem>>, vector<1x8x128xf32>
    %1 = vector.shape_cast %0 : vector<1x8x128xf32> to vector<8x128xf32>
    %c0_2 = arith.constant 0 : index
    %2 = memref.load %arg1[%c0_2] : memref<39xf32, #tpu.memory_space<smem>>
    %3 = vector.broadcast %2 : f32 to vector<8x128xf32>
    %4 = arith.mulf %3, %1 : vector<8x128xf32>
    %c22 = arith.constant 22 : index
    %5 = memref.load %arg1[%c22] : memref<39xf32, #tpu.memory_space<smem>>
    %6 = vector.broadcast %5 : f32 to vector<8x128xf32>
    %7 = arith.mulf %6, %1 : vector<8x128xf32>
    %c1 = arith.constant 1 : index
    %c0_3 = arith.constant 0 : index
    %c0_4 = arith.constant 0 : index
    %8 = vector.load %arg2[%c1, %c0_3, %c0_4] : memref<12x8x128xf32, #tpu.memory_space<vmem>>, vector<1x8x128xf32>
    %9 = vector.shape_cast %8 : vector<1x8x128xf32> to vector<8x128xf32>
    %c1_5 = arith.constant 1 : index
    %10 = memref.load %arg1[%c1_5] : memref<39xf32, #tpu.memory_space<smem>>
    %11 = vector.broadcast %10 : f32 to vector<8x128xf32>
    %12 = arith.mulf %11, %9 : vector<8x128xf32>
    %13 = arith.addf %4, %12 : vector<8x128xf32>
    %c23 = arith.constant 23 : index
    %14 = memref.load %arg1[%c23] : memref<39xf32, #tpu.memory_space<smem>>
    %15 = vector.broadcast %14 : f32 to vector<8x128xf32>
    %16 = arith.mulf %15, %9 : vector<8x128xf32>
    %17 = arith.addf %7, %16 : vector<8x128xf32>
    %c2 = arith.constant 2 : index
    %c0_6 = arith.constant 0 : index
    %c0_7 = arith.constant 0 : index
    %18 = vector.load %arg2[%c2, %c0_6, %c0_7] : memref<12x8x128xf32, #tpu.memory_space<vmem>>, vector<1x8x128xf32>
    %19 = vector.shape_cast %18 : vector<1x8x128xf32> to vector<8x128xf32>
    %c2_8 = arith.constant 2 : index
    %20 = memref.load %arg1[%c2_8] : memref<39xf32, #tpu.memory_space<smem>>
    %21 = vector.broadcast %20 : f32 to vector<8x128xf32>
    %22 = arith.mulf %21, %19 : vector<8x128xf32>
    %23 = arith.addf %13, %22 : vector<8x128xf32>
    %c24 = arith.constant 24 : index
    %24 = memref.load %arg1[%c24] : memref<39xf32, #tpu.memory_space<smem>>
    %25 = vector.broadcast %24 : f32 to vector<8x128xf32>
    %26 = arith.mulf %25, %19 : vector<8x128xf32>
    %27 = arith.addf %17, %26 : vector<8x128xf32>
    %c3 = arith.constant 3 : index
    %c0_9 = arith.constant 0 : index
    %c0_10 = arith.constant 0 : index
    %28 = vector.load %arg2[%c3, %c0_9, %c0_10] : memref<12x8x128xf32, #tpu.memory_space<vmem>>, vector<1x8x128xf32>
    %29 = vector.shape_cast %28 : vector<1x8x128xf32> to vector<8x128xf32>
    %c3_11 = arith.constant 3 : index
    %30 = memref.load %arg1[%c3_11] : memref<39xf32, #tpu.memory_space<smem>>
    %31 = vector.broadcast %30 : f32 to vector<8x128xf32>
    %32 = arith.mulf %31, %29 : vector<8x128xf32>
    %33 = arith.addf %23, %32 : vector<8x128xf32>
    %c25 = arith.constant 25 : index
    %34 = memref.load %arg1[%c25] : memref<39xf32, #tpu.memory_space<smem>>
    %35 = vector.broadcast %34 : f32 to vector<8x128xf32>
    %36 = arith.mulf %35, %29 : vector<8x128xf32>
    %37 = arith.addf %27, %36 : vector<8x128xf32>
    %c4 = arith.constant 4 : index
    %c0_12 = arith.constant 0 : index
    %c0_13 = arith.constant 0 : index
    %38 = vector.load %arg2[%c4, %c0_12, %c0_13] : memref<12x8x128xf32, #tpu.memory_space<vmem>>, vector<1x8x128xf32>
    %39 = vector.shape_cast %38 : vector<1x8x128xf32> to vector<8x128xf32>
    %c4_14 = arith.constant 4 : index
    %40 = memref.load %arg1[%c4_14] : memref<39xf32, #tpu.memory_space<smem>>
    %41 = vector.broadcast %40 : f32 to vector<8x128xf32>
    %42 = arith.mulf %41, %39 : vector<8x128xf32>
    %43 = arith.addf %33, %42 : vector<8x128xf32>
    %c26 = arith.constant 26 : index
    %44 = memref.load %arg1[%c26] : memref<39xf32, #tpu.memory_space<smem>>
    %45 = vector.broadcast %44 : f32 to vector<8x128xf32>
    %46 = arith.mulf %45, %39 : vector<8x128xf32>
    %47 = arith.addf %37, %46 : vector<8x128xf32>
    %c5 = arith.constant 5 : index
    %c0_15 = arith.constant 0 : index
    %c0_16 = arith.constant 0 : index
    %48 = vector.load %arg2[%c5, %c0_15, %c0_16] : memref<12x8x128xf32, #tpu.memory_space<vmem>>, vector<1x8x128xf32>
    %49 = vector.shape_cast %48 : vector<1x8x128xf32> to vector<8x128xf32>
    %c5_17 = arith.constant 5 : index
    %50 = memref.load %arg1[%c5_17] : memref<39xf32, #tpu.memory_space<smem>>
    %51 = vector.broadcast %50 : f32 to vector<8x128xf32>
    %52 = arith.mulf %51, %49 : vector<8x128xf32>
    %53 = arith.addf %43, %52 : vector<8x128xf32>
    %c27 = arith.constant 27 : index
    %54 = memref.load %arg1[%c27] : memref<39xf32, #tpu.memory_space<smem>>
    %55 = vector.broadcast %54 : f32 to vector<8x128xf32>
    %56 = arith.mulf %55, %49 : vector<8x128xf32>
    %57 = arith.addf %47, %56 : vector<8x128xf32>
    %c6 = arith.constant 6 : index
    %c0_18 = arith.constant 0 : index
    %c0_19 = arith.constant 0 : index
    %58 = vector.load %arg2[%c6, %c0_18, %c0_19] : memref<12x8x128xf32, #tpu.memory_space<vmem>>, vector<1x8x128xf32>
    %59 = vector.shape_cast %58 : vector<1x8x128xf32> to vector<8x128xf32>
    %c6_20 = arith.constant 6 : index
    %60 = memref.load %arg1[%c6_20] : memref<39xf32, #tpu.memory_space<smem>>
    %61 = vector.broadcast %60 : f32 to vector<8x128xf32>
    %62 = arith.mulf %61, %59 : vector<8x128xf32>
    %63 = arith.addf %53, %62 : vector<8x128xf32>
    %c28 = arith.constant 28 : index
    %64 = memref.load %arg1[%c28] : memref<39xf32, #tpu.memory_space<smem>>
    %65 = vector.broadcast %64 : f32 to vector<8x128xf32>
    %66 = arith.mulf %65, %59 : vector<8x128xf32>
    %67 = arith.addf %57, %66 : vector<8x128xf32>
    %c7 = arith.constant 7 : index
    %c0_21 = arith.constant 0 : index
    %c0_22 = arith.constant 0 : index
    %68 = vector.load %arg2[%c7, %c0_21, %c0_22] : memref<12x8x128xf32, #tpu.memory_space<vmem>>, vector<1x8x128xf32>
    %69 = vector.shape_cast %68 : vector<1x8x128xf32> to vector<8x128xf32>
    %c7_23 = arith.constant 7 : index
    %70 = memref.load %arg1[%c7_23] : memref<39xf32, #tpu.memory_space<smem>>
    %71 = vector.broadcast %70 : f32 to vector<8x128xf32>
    %72 = arith.mulf %71, %69 : vector<8x128xf32>
    %73 = arith.addf %63, %72 : vector<8x128xf32>
    %c29 = arith.constant 29 : index
    %74 = memref.load %arg1[%c29] : memref<39xf32, #tpu.memory_space<smem>>
    %75 = vector.broadcast %74 : f32 to vector<8x128xf32>
    %76 = arith.mulf %75, %69 : vector<8x128xf32>
    %77 = arith.addf %67, %76 : vector<8x128xf32>
    %c8 = arith.constant 8 : index
    %c0_24 = arith.constant 0 : index
    %c0_25 = arith.constant 0 : index
    %78 = vector.load %arg2[%c8, %c0_24, %c0_25] : memref<12x8x128xf32, #tpu.memory_space<vmem>>, vector<1x8x128xf32>
    %79 = vector.shape_cast %78 : vector<1x8x128xf32> to vector<8x128xf32>
    %c8_26 = arith.constant 8 : index
    %80 = memref.load %arg1[%c8_26] : memref<39xf32, #tpu.memory_space<smem>>
    %81 = vector.broadcast %80 : f32 to vector<8x128xf32>
    %82 = arith.mulf %81, %79 : vector<8x128xf32>
    %83 = arith.addf %73, %82 : vector<8x128xf32>
    %c30 = arith.constant 30 : index
    %84 = memref.load %arg1[%c30] : memref<39xf32, #tpu.memory_space<smem>>
    %85 = vector.broadcast %84 : f32 to vector<8x128xf32>
    %86 = arith.mulf %85, %79 : vector<8x128xf32>
    %87 = arith.addf %77, %86 : vector<8x128xf32>
    %c9 = arith.constant 9 : index
    %c0_27 = arith.constant 0 : index
    %c0_28 = arith.constant 0 : index
    %88 = vector.load %arg2[%c9, %c0_27, %c0_28] : memref<12x8x128xf32, #tpu.memory_space<vmem>>, vector<1x8x128xf32>
    %89 = vector.shape_cast %88 : vector<1x8x128xf32> to vector<8x128xf32>
    %c9_29 = arith.constant 9 : index
    %90 = memref.load %arg1[%c9_29] : memref<39xf32, #tpu.memory_space<smem>>
    %91 = vector.broadcast %90 : f32 to vector<8x128xf32>
    %92 = arith.mulf %91, %89 : vector<8x128xf32>
    %93 = arith.addf %83, %92 : vector<8x128xf32>
    %c31 = arith.constant 31 : index
    %94 = memref.load %arg1[%c31] : memref<39xf32, #tpu.memory_space<smem>>
    %95 = vector.broadcast %94 : f32 to vector<8x128xf32>
    %96 = arith.mulf %95, %89 : vector<8x128xf32>
    %97 = arith.addf %87, %96 : vector<8x128xf32>
    %c10 = arith.constant 10 : index
    %c0_30 = arith.constant 0 : index
    %c0_31 = arith.constant 0 : index
    %98 = vector.load %arg2[%c10, %c0_30, %c0_31] : memref<12x8x128xf32, #tpu.memory_space<vmem>>, vector<1x8x128xf32>
    %99 = vector.shape_cast %98 : vector<1x8x128xf32> to vector<8x128xf32>
    %c10_32 = arith.constant 10 : index
    %100 = memref.load %arg1[%c10_32] : memref<39xf32, #tpu.memory_space<smem>>
    %101 = vector.broadcast %100 : f32 to vector<8x128xf32>
    %102 = arith.mulf %101, %99 : vector<8x128xf32>
    %103 = arith.addf %93, %102 : vector<8x128xf32>
    %c32 = arith.constant 32 : index
    %104 = memref.load %arg1[%c32] : memref<39xf32, #tpu.memory_space<smem>>
    %105 = vector.broadcast %104 : f32 to vector<8x128xf32>
    %106 = arith.mulf %105, %99 : vector<8x128xf32>
    %107 = arith.addf %97, %106 : vector<8x128xf32>
    %c11 = arith.constant 11 : index
    %c0_33 = arith.constant 0 : index
    %c0_34 = arith.constant 0 : index
    %108 = vector.load %arg2[%c11, %c0_33, %c0_34] : memref<12x8x128xf32, #tpu.memory_space<vmem>>, vector<1x8x128xf32>
    %109 = vector.shape_cast %108 : vector<1x8x128xf32> to vector<8x128xf32>
    %c11_35 = arith.constant 11 : index
    %110 = memref.load %arg1[%c11_35] : memref<39xf32, #tpu.memory_space<smem>>
    %111 = vector.broadcast %110 : f32 to vector<8x128xf32>
    %112 = arith.mulf %111, %109 : vector<8x128xf32>
    %113 = arith.addf %103, %112 : vector<8x128xf32>
    %c33 = arith.constant 33 : index
    %114 = memref.load %arg1[%c33] : memref<39xf32, #tpu.memory_space<smem>>
    %115 = vector.broadcast %114 : f32 to vector<8x128xf32>
    %116 = arith.mulf %115, %109 : vector<8x128xf32>
    %117 = arith.addf %107, %116 : vector<8x128xf32>
    %c12 = arith.constant 12 : index
    %118 = memref.load %arg1[%c12] : memref<39xf32, #tpu.memory_space<smem>>
    %119 = vector.broadcast %118 : f32 to vector<8x128xf32>
    %120 = arith.addf %113, %119 : vector<8x128xf32>
    %cst = arith.constant 0.000000e+00 : f32
    %121 = vector.broadcast %cst : f32 to vector<8x128xf32>
    %122 = arith.maximumf %120, %121 : vector<8x128xf32>
    %c13 = arith.constant 13 : index
    %123 = memref.load %arg1[%c13] : memref<39xf32, #tpu.memory_space<smem>>
    %124 = vector.broadcast %123 : f32 to vector<8x128xf32>
    %125 = arith.mulf %124, %122 : vector<8x128xf32>
    %c19 = arith.constant 19 : index
    %126 = memref.load %arg1[%c19] : memref<39xf32, #tpu.memory_space<smem>>
    %127 = vector.broadcast %126 : f32 to vector<8x128xf32>
    %128 = arith.addf %125, %127 : vector<8x128xf32>
    %c14 = arith.constant 14 : index
    %129 = memref.load %arg1[%c14] : memref<39xf32, #tpu.memory_space<smem>>
    %c0_36 = arith.constant 0 : index
    %c0_37 = arith.constant 0 : index
    %c0_38 = arith.constant 0 : index
    %130 = vector.load %arg3[%c0_36, %c0_37, %c0_38] : memref<5x8x128xf32, #tpu.memory_space<vmem>>, vector<1x8x128xf32>
    %131 = vector.shape_cast %130 : vector<1x8x128xf32> to vector<8x128xf32>
    %132 = vector.broadcast %129 : f32 to vector<8x128xf32>
    %133 = arith.mulf %132, %131 : vector<8x128xf32>
    %134 = arith.addf %128, %133 : vector<8x128xf32>
    %c15 = arith.constant 15 : index
    %135 = memref.load %arg1[%c15] : memref<39xf32, #tpu.memory_space<smem>>
    %c1_39 = arith.constant 1 : index
    %c0_40 = arith.constant 0 : index
    %c0_41 = arith.constant 0 : index
    %136 = vector.load %arg3[%c1_39, %c0_40, %c0_41] : memref<5x8x128xf32, #tpu.memory_space<vmem>>, vector<1x8x128xf32>
    %137 = vector.shape_cast %136 : vector<1x8x128xf32> to vector<8x128xf32>
    %138 = vector.broadcast %135 : f32 to vector<8x128xf32>
    %139 = arith.mulf %138, %137 : vector<8x128xf32>
    %140 = arith.addf %134, %139 : vector<8x128xf32>
    %c16 = arith.constant 16 : index
    %141 = memref.load %arg1[%c16] : memref<39xf32, #tpu.memory_space<smem>>
    %c2_42 = arith.constant 2 : index
    %c0_43 = arith.constant 0 : index
    %c0_44 = arith.constant 0 : index
    %142 = vector.load %arg3[%c2_42, %c0_43, %c0_44] : memref<5x8x128xf32, #tpu.memory_space<vmem>>, vector<1x8x128xf32>
    %143 = vector.shape_cast %142 : vector<1x8x128xf32> to vector<8x128xf32>
    %144 = vector.broadcast %141 : f32 to vector<8x128xf32>
    %145 = arith.mulf %144, %143 : vector<8x128xf32>
    %146 = arith.addf %140, %145 : vector<8x128xf32>
    %c17 = arith.constant 17 : index
    %147 = memref.load %arg1[%c17] : memref<39xf32, #tpu.memory_space<smem>>
    %c3_45 = arith.constant 3 : index
    %c0_46 = arith.constant 0 : index
    %c0_47 = arith.constant 0 : index
    %148 = vector.load %arg3[%c3_45, %c0_46, %c0_47] : memref<5x8x128xf32, #tpu.memory_space<vmem>>, vector<1x8x128xf32>
    %149 = vector.shape_cast %148 : vector<1x8x128xf32> to vector<8x128xf32>
    %150 = vector.broadcast %147 : f32 to vector<8x128xf32>
    %151 = arith.mulf %150, %149 : vector<8x128xf32>
    %152 = arith.addf %146, %151 : vector<8x128xf32>
    %c18 = arith.constant 18 : index
    %153 = memref.load %arg1[%c18] : memref<39xf32, #tpu.memory_space<smem>>
    %c4_48 = arith.constant 4 : index
    %c0_49 = arith.constant 0 : index
    %c0_50 = arith.constant 0 : index
    %154 = vector.load %arg3[%c4_48, %c0_49, %c0_50] : memref<5x8x128xf32, #tpu.memory_space<vmem>>, vector<1x8x128xf32>
    %155 = vector.shape_cast %154 : vector<1x8x128xf32> to vector<8x128xf32>
    %156 = vector.broadcast %153 : f32 to vector<8x128xf32>
    %157 = arith.mulf %156, %155 : vector<8x128xf32>
    %158 = arith.addf %152, %157 : vector<8x128xf32>
    %cst_51 = arith.constant 0.000000e+00 : f32
    %159 = vector.broadcast %cst_51 : f32 to vector<8x128xf32>
    %160 = arith.maximumf %158, %159 : vector<8x128xf32>
    %c20 = arith.constant 20 : index
    %161 = memref.load %arg1[%c20] : memref<39xf32, #tpu.memory_space<smem>>
    %162 = vector.broadcast %161 : f32 to vector<8x128xf32>
    %163 = arith.mulf %162, %122 : vector<8x128xf32>
    %164 = arith.addf %117, %163 : vector<8x128xf32>
    %c21 = arith.constant 21 : index
    %165 = memref.load %arg1[%c21] : memref<39xf32, #tpu.memory_space<smem>>
    %166 = vector.broadcast %165 : f32 to vector<8x128xf32>
    %167 = arith.mulf %166, %160 : vector<8x128xf32>
    %168 = arith.addf %164, %167 : vector<8x128xf32>
    %c34 = arith.constant 34 : index
    %169 = memref.load %arg1[%c34] : memref<39xf32, #tpu.memory_space<smem>>
    %170 = vector.broadcast %169 : f32 to vector<8x128xf32>
    %171 = arith.addf %168, %170 : vector<8x128xf32>
    %cst_52 = arith.constant 0.000000e+00 : f32
    %172 = vector.broadcast %cst_52 : f32 to vector<8x128xf32>
    %173 = arith.maximumf %171, %172 : vector<8x128xf32>
    %c35 = arith.constant 35 : index
    %174 = memref.load %arg1[%c35] : memref<39xf32, #tpu.memory_space<smem>>
    %175 = vector.broadcast %174 : f32 to vector<8x128xf32>
    %176 = arith.mulf %175, %122 : vector<8x128xf32>
    %c36 = arith.constant 36 : index
    %177 = memref.load %arg1[%c36] : memref<39xf32, #tpu.memory_space<smem>>
    %178 = vector.broadcast %177 : f32 to vector<8x128xf32>
    %179 = arith.mulf %178, %160 : vector<8x128xf32>
    %180 = arith.addf %176, %179 : vector<8x128xf32>
    %c37 = arith.constant 37 : index
    %181 = memref.load %arg1[%c37] : memref<39xf32, #tpu.memory_space<smem>>
    %182 = vector.broadcast %181 : f32 to vector<8x128xf32>
    %183 = arith.mulf %182, %173 : vector<8x128xf32>
    %184 = arith.addf %180, %183 : vector<8x128xf32>
    %c38 = arith.constant 38 : index
    %185 = memref.load %arg1[%c38] : memref<39xf32, #tpu.memory_space<smem>>
    %186 = vector.broadcast %185 : f32 to vector<8x128xf32>
    %187 = arith.addf %184, %186 : vector<8x128xf32>
    %c0_53 = arith.constant 0 : index
    %c0_54 = arith.constant 0 : index
    %188 = vector.load %arg4[%c0_53, %c0_54] : memref<8x128xf32, #tpu.memory_space<vmem>>, vector<8x128xf32>
    tpu.vector_store %arg4[%c0_53, %c0_54], %187 {strides = array<i32>} : memref<8x128xf32, #tpu.memory_space<vmem>>, vector<8x128xf32>,
    return
  }
  func.func @transform_0(%arg0: i32) -> i32 {
    %c0_i32 = arith.constant 0 : i32
    %c0_i32_0 = arith.constant 0 : i32
    return %c0_i32 : i32
  }
  func.func @transform_1(%arg0: i32) -> (i32, i32, i32) {
    %c0_i32 = arith.constant 0 : i32
    %c0_i32_0 = arith.constant 0 : i32
    %c0_i32_1 = arith.constant 0 : i32
    return %c0_i32, %arg0, %c0_i32_0 : i32, i32, i32
  }
  func.func @transform_2(%arg0: i32) -> (i32, i32, i32) {
    %c0_i32 = arith.constant 0 : i32
    %c0_i32_0 = arith.constant 0 : i32
    %c0_i32_1 = arith.constant 0 : i32
    return %c0_i32, %arg0, %c0_i32_0 : i32, i32, i32
  }
  func.func @transform_3(%arg0: i32) -> (i32, i32) {
    %c0_i32 = arith.constant 0 : i32
    %c0_i32_0 = arith.constant 0 : i32
    return %arg0, %c0_i32 : i32, i32
  }
}

</mosaic_0001>

<bundles_post_ra>
// kernel: tpu_custom_call.1
= control target key start
LH: loop header
LB: loop body
LE: loop exit
PB: predicated region body
PF: predicated region fallthrough
CT: control target
= control target key end

     0   :  { %8 = vsyncpa [#allocation5], 0  ;;  %s452_s0 = inlined_call_operand.hbm [shape: f32[39], index: 0, kind: input, shape index: {}]   ;;  %s453_s1 = inlined_call_operand.hbm [shape: f32[12,8,128], index: 1, kind: input, shape index: {}]   ;;  %s454_s2 = inlined_call_operand.hbm [shape: f32[5,8,128], index: 2, kind: input, shape index: {}]   ;;  %s455_s3 = inlined_call_operand.hbm [shape: f32[8,128], index: 3, kind: output, shape index: {}]  }
   0x1   :  { %9 = vsyncpa [#allocation3], 0 }
   0x2   :  { %10 = vsyncpa [#allocation8], 0 }
   0x3   :  { %11 = vsyncpa [#allocation4], 0  ;;  %s375_s12 = smov [#allocation2]   ;;  %s376_s15 = smov [#allocation6]  }
   0x4   :  { %19 = dma.hbm_to_smem %s452_s0, 16, %s375_s12, [#allocation5]  }
   0x5   :  { %s25_s16 = sshll.u32 %s376_s15, 4  ;;  %s26_s16 = int_to_ptr.vmem [resolvable:$true] %s25_s16 }
   0x6   :  { %s315_s17 = scalar_lea.vmem %s26_s16, 1536  ;;  %p320_p1 = scmp.lt.s32.totalorder %s26_s16, %s26_s16 }
   0x7   :  { %p316_p0 = scmp.ne.s32.totalorder %s26_s16, %s315_s17  ;;  %p321_p2 = scmp.lt.s32.totalorder %s315_s17, %s315_s17 }
   0x9   :  { %p322_p3 = por %p321_p2, %p320_p1 }
   0xb   :  { %p323_p4 = pnand %p322_p3, %p316_p0 }
   0xd   :  { %326 = shalt.err (!%p323_p4)
}
   0xe   :  { %s377_s18 = smov 128   ;;  %s378_s19 = smov 8  }
   0xf   :  { %31 = dma.hbm_to_vmem [thread:$0]  %s453_s1, 1536, %s26_s16, [#allocation3], %s377_s18, %s377_s18, %s378_s19  }
  0x10   :  { %s379_s22 = smov [#allocation7]  }
  0x11   :  { %s37_s23 = sshll.u32 %s379_s22, 4  ;;  %s38_s23 = int_to_ptr.vmem [resolvable:$true] %s37_s23 }
  0x12   :  { %s335_s0 = scalar_lea.vmem %s38_s23, 640  ;;  %p340_p6 = scmp.lt.s32.totalorder %s38_s23, %s38_s23 }
  0x13   :  { %p336_p5 = scmp.ne.s32.totalorder %s38_s23, %s335_s0  ;;  %p341_p7 = scmp.lt.s32.totalorder %s335_s0, %s335_s0 }
  0x15   :  { %p342_p8 = por %p341_p7, %p340_p6 }
  0x17   :  { %p343_p9 = pnand %p342_p8, %p336_p5 }
  0x19   :  { %346 = shalt.err (!%p343_p9)
}
  0x1a   :  { %43 = dma.hbm_to_vmem [thread:$0]  %s454_s2, 640, %s38_s23, [#allocation8], %s377_s18, %s377_s18, %s378_s19  }
  0x1b   :  { %367 = dma.done.wait [#allocation5], 16  }
  0x1c   :  { %368 = vsyncadd [#allocation5], 4294967280 }
  0x1d   :  { %369 = dma.done.wait [#allocation3], 1536  }
  0x1e   :  { %370 = vsyncadd [#allocation3], 4294965760 }
  0x1f   :  { %371 = dma.done.wait [#allocation8], 640  }
  0x20   :  { %372 = vsyncadd [#allocation8], 4294966656 }
  0x21   :  { %53 = sfence }
  0x22   :  { %s55_s1 = sld [smem:[#allocation2]]  ;;  %v54_v0 = vld [vmem:[#allocation6] sm:$0xff]  ;;  %v62_v2 = vld [vmem:[#allocation6 + $0x8] sm:$0xff]  ;;  %v72_v7 = vld [vmem:[#allocation6 + $0x10] sm:$0xff] }
  0x23   :  { %s255_s26 = sld [smem:[#allocation2 + $0x16]]  ;;  %v82_v12 = vld [vmem:[#allocation6 + $0x18] sm:$0xff]  ;;  %v92_v19 = vld [vmem:[#allocation6 + $0x20] sm:$0xff]  ;;  %v102_v26 = vld [vmem:[#allocation6 + $0x28] sm:$0xff] }
  0x24   :  { %s256_s27 = sld [smem:[#allocation2 + $0x1]]  ;;  %v112_v33 = vld [vmem:[#allocation6 + $0x30] sm:$0xff]  ;;  %v122_v38 = vld [vmem:[#allocation6 + $0x38] sm:$0xff]  ;;  %v132_v45 = vld [vmem:[#allocation6 + $0x40] sm:$0xff] }
  0x25   :  { %s257_s28 = sld [smem:[#allocation2 + $0x17]]  ;;  %v142_v49 = vld [vmem:[#allocation6 + $0x48] sm:$0xff]  ;;  %v152_v56 = vld [vmem:[#allocation6 + $0x50] sm:$0xff]  ;;  %v162_v60 = vld [vmem:[#allocation6 + $0x58] sm:$0xff] }
  0x26   :  { %s258_s29 = sld [smem:[#allocation2 + $0x2]] }
  0x27   :  { %s259_s30 = sld [smem:[#allocation2 + $0x18]] }
  0x28   :  { %v56_v1 = vstv %s55_s1  ;;  %s260_s4 = sld [smem:[#allocation2 + $0x3]] }
  0x29   :  { %v57_v3 = vmul.f32 %v56_v1, %v54_v0  ;;  %v59_v4 = vstv %s255_s26  ;;  %s261_s2 = sld [smem:[#allocation2 + $0x19]] }
  0x2a   :  { %v60_v5 = vmul.f32 %v59_v4, %v54_v0  ;;  %v64_v6 = vstv %s256_s27  ;;  %s262_s5 = sld [smem:[#allocation2 + $0x4]] }
  0x2b   :  { %v65_v8 = vmul.f32 %v64_v6, %v62_v2  ;;  %v68_v9 = vstv %s257_s28  ;;  %s263_s6 = sld [smem:[#allocation2 + $0x1a]] }
  0x2c   :  { %v69_v10 = vmul.f32 %v68_v9, %v62_v2  ;;  %v74_v11 = vstv %s258_s29  ;;  %s264_s7 = sld [smem:[#allocation2 + $0x5]] }
  0x2d   :  { %v66_v13 = vadd.f32 %v65_v8, %v57_v3  ;;  %v75_v14 = vmul.f32 %v74_v11, %v72_v7  ;;  %v78_v15 = vstv %s259_s30  ;;  %s410_s8 = sld [smem:[#allocation2 + $0x1b]] }
  0x2e   :  { %v70_v16 = vadd.f32 %v69_v10, %v60_v5  ;;  %v79_v17 = vmul.f32 %v78_v15, %v72_v7  ;;  %v84_v18 = vstv %s260_s4  ;;  %s266_s9 = sld [smem:[#allocation2 + $0x6]] }
  0x2f   :  { %v76_v20 = vadd.f32 %v75_v14, %v66_v13  ;;  %v85_v21 = vmul.f32 %v84_v18, %v82_v12  ;;  %v88_v22 = vstv %s261_s2  ;;  %s412_s10 = sld [smem:[#allocation2 + $0x1c]] }
  0x30   :  { %v80_v23 = vadd.f32 %v79_v17, %v70_v16  ;;  %v89_v24 = vmul.f32 %v88_v22, %v82_v12  ;;  %v94_v25 = vstv %s262_s5  ;;  %s268_s11 = sld [smem:[#allocation2 + $0x7]]  ;;  %v182_v12 = vld [vmem:[#allocation7] sm:$0xff] }
  0x31   :  { %v86_v27 = vadd.f32 %v85_v21, %v76_v20  ;;  %v95_v28 = vmul.f32 %v94_v25, %v92_v19  ;;  %v98_v29 = vstv %s263_s6  ;;  %s414_s12 = sld [smem:[#allocation2 + $0x1d]]  ;;  %s380_s6 = smov [#allocation9]  }
  0x32   :  { %v90_v30 = vadd.f32 %v89_v24, %v80_v23  ;;  %v99_v31 = vmul.f32 %v98_v29, %v92_v19  ;;  %v104_v32 = vstv %s264_s7  ;;  %s270_s13 = sld [smem:[#allocation2 + $0x8]]  ;;  %v188_v19 = vld [vmem:[#allocation7 + $0x8] sm:$0xff]  ;;  %v194_v23 = vld [vmem:[#allocation7 + $0x10] sm:$0xff]  ;;  %s244_s7 = sshll.u32 %s380_s6, 4  ;;  %s245_s7 = int_to_ptr.vmem [resolvable:$true] %s244_s7 }
  0x33   :  { %v96_v34 = vadd.f32 %v95_v28, %v86_v27  ;;  %v105_v35 = vmul.f32 %v104_v32, %v102_v26  ;;  %v108_v36 = vstv %s410_s8  ;;  %s272_s14 = sld [smem:[#allocation2 + $0x9]]  ;;  %s347_s8 = scalar_lea.vmem %s245_s7, 128 }
  0x34   :  { %v114_v37 = vstv %s266_s9  ;;  %v100_v39 = vadd.f32 %v99_v31, %v90_v30  ;;  %v109_v41 = vmul.f32 %v108_v36, %v102_v26  ;;  %s417_s15 = sld [smem:[#allocation2 + $0x1e]]  ;;  %v200_v30 = vld [vmem:[#allocation7 + $0x18] sm:$0xff]  ;;  %p348_p10 = scmp.ne.s32.totalorder %s245_s7, %s347_s8 }
  0x35   :  { %v106_v40 = vadd.f32 %v105_v35, %v96_v34  ;;  %v115_v42 = vmul.f32 %v114_v37, %v112_v33  ;;  %v118_v43 = vstv %s412_s10  ;;  %s274_s16 = sld [smem:[#allocation2 + $0xa]]  ;;  %v206_v34 = vld [vmem:[#allocation7 + $0x20] sm:$0xff]  ;;  %p352_p11 = scmp.lt.s32.totalorder %s245_s7, %s245_s7 }
  0x36   :  { %v124_v44 = vstv %s268_s11  ;;  %s420_s17 = sld [smem:[#allocation2 + $0x1f]]  ;;  %v110_v50 = vadd.f32 %v109_v41, %v100_v39  ;;  %v119_v51 = vmul.f32 %v118_v43, %v112_v33  ;;  %p353_p12 = scmp.lt.s32.totalorder %s347_s8, %s347_s8 }
  0x37   :  { %v116_v46 = vadd.f32 %v115_v42, %v106_v40  ;;  %v125_v47 = vmul.f32 %v124_v44, %v122_v38  ;;  %s276_s18 = sld [smem:[#allocation2 + $0xb]]  ;;  %v128_v54 = vstv %s414_s12 }
  0x38   :  { %v134_v48 = vstv %s270_s13  ;;  %s422_s19 = sld [smem:[#allocation2 + $0x20]]  ;;  %v120_v61 = vadd.f32 %v119_v51, %v110_v50  ;;  %v129_v62 = vmul.f32 %v128_v54, %v122_v38  ;;  %p354_p13 = por %p353_p12, %p352_p11 }
  0x39   :  { %v126_v52 = vadd.f32 %v125_v47, %v116_v46  ;;  %v135_v53 = vmul.f32 %v134_v48, %v132_v45  ;;  %v144_v55 = vstv %s272_s14  ;;  %s278_s20 = sld [smem:[#allocation2 + $0xc]] }
  0x3a   :  { %v145_v58 = vmul.f32 %v144_v55, %v142_v49  ;;  %s425_s21 = sld [smem:[#allocation2 + $0xd]]  ;;  %v138_v1 = vstv %s417_s15  ;;  %v130_v6 = vadd.f32 %v129_v62, %v120_v61  ;;  %p355_p0 = pnand %p354_p13, %p348_p10 }
  0x3b   :  { %v136_v57 = vadd.f32 %v135_v53, %v126_v52  ;;  %v154_v59 = vstv %s274_s16  ;;  %s427_s22 = sld [smem:[#allocation2 + $0x13]]  ;;  %v139_v7 = vmul.f32 %v138_v1, %v132_v45 }
  0x3c   :  { %v155_v0 = vmul.f32 %v154_v59, %v152_v56  ;;  %s281_s23 = sld [smem:[#allocation2 + $0xe]]  ;;  %v148_v9 = vstv %s420_s17 }
  0x3d   :  { %v146_v63 = vadd.f32 %v145_v58, %v136_v57  ;;  %v164_v2 = vstv %s276_s18  ;;  %s430_s0 = sld [smem:[#allocation2 + $0xf]]  ;;  %v140_v14 = vadd.f32 %v139_v7, %v130_v6  ;;  %v149_v15 = vmul.f32 %v148_v9, %v142_v49 }
  0x3e   :  { %v165_v4 = vmul.f32 %v164_v2, %v162_v60  ;;  %s432_s24 = sld [smem:[#allocation2 + $0x10]]  ;;  %v158_v17 = vstv %s422_s19 }
  0x3f   :  { %v156_v3 = vadd.f32 %v155_v0, %v146_v63  ;;  %v172_v5 = vstv %s278_s20  ;;  %s434_s25 = sld [smem:[#allocation2 + $0x21]]  ;;  %v150_v25 = vadd.f32 %v149_v15, %v140_v14  ;;  %v159_v26 = vmul.f32 %v158_v17, %v152_v56 }
  0x40   :  { %s437_s1 = sld [smem:[#allocation2 + $0x11]]  ;;  %v176_v11 = vstv %s425_s21 }
  0x41   :  { %v166_v8 = vadd.f32 %v165_v4, %v156_v3  ;;  %s440_s26 = sld [smem:[#allocation2 + $0x12]]  ;;  %v179_v18 = vstv %s427_s22  ;;  %v160_v36 = vadd.f32 %v159_v26, %v150_v25 }
  0x42   :  { %v183_v13 = vstv %s281_s23  ;;  %s286_s27 = sld [smem:[#allocation2 + $0x14]] }
  0x43   :  { %v173_v10 = vadd.f32 %v172_v5, %v166_v8  ;;  %v189_v20 = vstv %s430_s0  ;;  %v184_v22 = vmul.f32 %v183_v13, %v182_v12  ;;  %s287_s28 = sld [smem:[#allocation2 + $0x15]] }
  0x44   :  { %v195_v24 = vstv %s432_s24  ;;  %v190_v28 = vmul.f32 %v189_v20, %v188_v19  ;;  %s289_s29 = sld [smem:[#allocation2 + $0x23]] }
  0x45   :  { %v174_v16 = vmax.f32 %v173_v10, 0.0  ;;  %v168_v29 = vstv %s434_s25  ;;  %v196_v33 = vmul.f32 %v195_v24, %v194_v23  ;;  %s290_s30 = sld [smem:[#allocation2 + $0x24]] }
  0x46   :  { %v201_v31 = vstv %s437_s1  ;;  %v169_v37 = vmul.f32 %v168_v29, %v162_v60  ;;  %s288_s4 = sld [smem:[#allocation2 + $0x22]] }
  0x47   :  { %v177_v21 = vmul.f32 %v176_v11, %v174_v16  ;;  %v207_v35 = vstv %s440_s26  ;;  %v202_v39 = vmul.f32 %v201_v31, %v200_v30  ;;  %s291_s2 = sld [smem:[#allocation2 + $0x25]] }
  0x48   :  { %v212_v40 = vstv %s286_s27  ;;  %v208_v42 = vmul.f32 %v207_v35, %v206_v34  ;;  %v170_v43 = vadd.f32 %v169_v37, %v160_v36  ;;  %s292_s5 = sld [smem:[#allocation2 + $0x26]] }
  0x49   :  { %v180_v27 = vadd.f32 %v179_v18, %v177_v21  ;;  %v213_v45 = vmul.f32 %v212_v40, %v174_v16  ;;  %v216_v47 = vstv %s287_s28 }
  0x4a   :  { %v224_v50 = vstv %s289_s29 }
  0x4b   :  { %v185_v32 = vadd.f32 %v184_v22, %v180_v27  ;;  %v214_v49 = vadd.f32 %v213_v45, %v170_v43  ;;  %v227_v51 = vstv %s290_s30  ;;  %v225_v55 = vmul.f32 %v224_v50, %v174_v16 }
  0x4c   :  { %v220_v53 = vstv %s288_s4 }
  0x4d   :  { %v191_v38 = vadd.f32 %v190_v28, %v185_v32  ;;  %v231_v58 = vstv %s291_s2 }
  0x4e   :  { %v235_v62 = vstv %s292_s5 }
  0x4f   :  { %v197_v41 = vadd.f32 %v196_v33, %v191_v38 }
  0x51   :  { %v203_v44 = vadd.f32 %v202_v39, %v197_v41 }
  0x53   :  { %v209_v46 = vadd.f32 %v208_v42, %v203_v44 }
  0x55   :  { %v210_v48 = vmax.f32 %v209_v46, 0.0 }
  0x57   :  { %v217_v52 = vmul.f32 %v216_v47, %v210_v48  ;;  %v228_v56 = vmul.f32 %v227_v51, %v210_v48 }
  0x59   :  { %v218_v54 = vadd.f32 %v217_v52, %v214_v49  ;;  %v229_v60 = vadd.f32 %v228_v56, %v225_v55 }
  0x5b   :  { %v221_v57 = vadd.f32 %v220_v53, %v218_v54 }
  0x5d   :  { %v222_v59 = vmax.f32 %v221_v57, 0.0 }
  0x5f   :  { %v232_v61 = vmul.f32 %v231_v58, %v222_v59 }
  0x61   :  { %v233_v63 = vadd.f32 %v232_v61, %v229_v60 }
  0x63   :  { %v236_v0 = vadd.f32 %v235_v62, %v233_v63 }
  0x65   :  { %237 = vst [vmem:[#allocation9] sm:$0xff] %v236_v0 }
  0x66   :  { %358 = shalt.err (!%p355_p0)
}
  0x67   :  { %247 = dma.vmem_to_hbm [thread:$0]  %s245_s7, 128, %s455_s3, [#allocation4]  }
  0x68   :  { %373 = dma.done.wait [#allocation4], 128  }
  0x69   :  { %374 = vsyncadd [#allocation4], 4294967168 }
  0x6a   :  { %251 = vsyncpa [#allocation3], 1 }
  0x6b   :  { %252 = vsyncpa [#allocation8], 1 }
  0x6c   :  { %253 = vsyncpa [#allocation4], 1 }
  0x6d   :  { %254 = vsyncpa [#allocation5], 1 }

</bundles_post_ra>
